<compile_context>
chip_gen: v6e
topology: v6e:2x2x1
jax: 0.10.0
libtpu: 0.0.40
codegen_flags: <defaults>
</compile_context>

<pallas_src>
import functools

import jax
import jax.numpy as jnp
import numpy as np
from jax import lax
from jax.experimental import pallas as pl
from jax.experimental.pallas import tpu as pltpu


def self_attn_block_kernel(
    x_ref, ln_ref, w1_ref, b1_ref, w2_ref, b2_ref, wres_ref, bres_ref,
    o_ref, attn_cat_ref, *, heads):
  Nb, S, D = x_ref.shape
  M = Nb * S
  H = heads
  DH = D // H
  HID = w2_ref.shape[1]
  cdt = w1_ref.dtype                      # bf16 fast path or f32 exact path
  bf16_mode = jnp.dtype(cdt) == jnp.dtype(jnp.bfloat16)

  # ---- fold the Nb batch elements into the matmul M dimension ----
  x = x_ref[...].reshape(M, D)            # (M, D) f32

  # ---- LayerNorm (f32, eps=1e-5, elementwise affine) ----
  gamma = ln_ref[0:1, :]
  beta = ln_ref[1:2, :]
  mu = jnp.mean(x, axis=-1, keepdims=True)
  var = jnp.mean(jnp.square(x - mu), axis=-1, keepdims=True)
  xn = (x - mu) * lax.rsqrt(var + 1e-5)
  xn = xn * gamma + beta

  # ---- fused Q/K/V first layer: one MXU matmul, SiLU in f32 ----
  h = lax.dot_general(xn.astype(cdt), w1_ref[...], (((1,), (0,)), ((), ())),
                      preferred_element_type=jnp.float32) + b1_ref[...]
  h = h * jax.nn.sigmoid(h)               # SiLU
  h = h.astype(cdt)                       # (M, 3*HID)

  inv_sqrt_dh = 1.0 / (DH ** 0.5)

  # ---- second layer: lane-dense (M, HID) @ (HID, D) matmuls, cast once ----
  def proj(stream, scale=None):
    hx = h[:, stream * HID:(stream + 1) * HID]            # (M, HID)
    out = lax.dot_general(hx, w2_ref[stream], (((1,), (0,)), ((), ())),
                          preferred_element_type=jnp.float32)
    out = out + b2_ref[stream]                            # (M, D) f32
    if scale is not None:
      out = out * scale
    return out.astype(cdt)                                # single cast to cdt

  q2 = proj(0, inv_sqrt_dh)                # fold 1/sqrt(DH) before the cast
  k2 = proj(1)
  v2 = proj(2)

  # ---- head split: (M, D) -> (H*Nb, S, DH); batch index = h*Nb + n ----
  def to_heads(t):
    return jnp.concatenate(
        [t[:, hh * DH:(hh + 1) * DH].reshape(Nb, S, DH) for hh in range(H)],
        axis=0)

  qh = to_heads(q2)
  kh = to_heads(k2)
  vh = to_heads(v2)

  # ---- batched (S, S) attention with an in-kernel causal mask ----
  s = lax.dot_general(qh, kh, (((2,), (2,)), ((0,), (0,))),
                      preferred_element_type=jnp.float32)  # (H*Nb, S, S) f32
  row = lax.broadcasted_iota(jnp.int32, (S, S), 0)
  col = lax.broadcasted_iota(jnp.int32, (S, S), 1)
  causal = (col <= row)[None, :, :]
  s = jnp.where(causal, s, -1e30)

  m = jnp.max(s, axis=-1, keepdims=True)
  e = jnp.exp(s - m)
  denom = jnp.sum(e, axis=-1, keepdims=True)
  if bf16_mode:
    p = e * pl.reciprocal(denom, approx=True)              # EUP, frees VPU slots
  else:
    p = e / denom                                          # exact f32 path
  p = p.astype(cdt)

  attn = lax.dot_general(p, vh, (((2,), (1,)), ((0,), (0,))),
                         preferred_element_type=jnp.float32)   # (H*Nb, S, DH)

  # ---- merge heads back to concat layout (M, D) via VMEM staging buffer ----
  for hh in range(H):
    blk = attn[hh * Nb:(hh + 1) * Nb].reshape(M, DH)
    attn_cat_ref[:, hh * DH:(hh + 1) * DH] = blk.astype(cdt)

  # ---- residual linear: full K = D contraction, + skip(init_x), SiLU ----
  y = lax.dot_general(attn_cat_ref[...], wres_ref[...], (((1,), (0,)), ((), ())),
                      preferred_element_type=jnp.float32)  # (M, D) f32
  y = y + bres_ref[...] + x
  y = y * jax.nn.sigmoid(y)
  o_ref[...] = y.reshape(Nb, S, D).astype(o_ref.dtype)


def _hw_budgets():
  """Per-TPU-generation (vmem_limit_bytes, target_rows)."""
  try:
    info = pltpu.get_tpu_info()
    vmem_phys = getattr(info, "vmem_capacity_bytes", None)
  except Exception:
    vmem_phys = None
  if vmem_phys is not None and vmem_phys > 96 * 1024 * 1024:
    # v5e / v6e: 128 MiB physical VMEM -> larger working set per grid step.
    return 64 * 1024 * 1024, 512
  # v7x (64 MiB) or unknown: stay conservative.
  return 32 * 1024 * 1024, 256


def _pick_batch_fold(n, s, target_rows, min_grid=2):
  """Largest divisor of n near the MXU row target, keeping grid >= min_grid."""
  cap_rows = max(1, target_rows // max(s, 1))
  cap_grid = n if n < min_grid else n // min_grid   # keep >= 2 steps for v7x TCs
  cap = max(1, min(cap_rows, cap_grid))
  best = 1
  for d in range(1, cap + 1):
    if n % d == 0:
      best = d
  return best


def self_attention_block(x, params, heads, *, compute_dtype=jnp.bfloat16,
                         target_rows=None, vmem_limit_bytes=None):
  N, S, D = x.shape
  HID = params['wq1'].shape[1]
  assert D % heads == 0
  cdt = jnp.dtype(compute_dtype)

  auto_vmem, auto_rows = _hw_budgets()
  if vmem_limit_bytes is None:
    vmem_limit_bytes = auto_vmem
  if target_rows is None:
    target_rows = auto_rows

  Nb = _pick_batch_fold(N, S, target_rows)
  M = Nb * S

  # ---- host-side packing (done once in practice) ----
  w1 = jnp.concatenate([params['wq1'], params['wk1'], params['wv1']],
                       axis=1).astype(cdt)                        # (D, 3*HID)
  b1 = jnp.concatenate([params['bq1'], params['bk1'], params['bv1']],
                       axis=1)                                    # (1, 3*HID)
  w2 = jnp.stack([params['wq2'], params['wk2'], params['wv2']],
                 axis=0).astype(cdt)                              # (3, HID, D)
  b2 = jnp.stack([params['bq2'], params['bk2'], params['bv2']],
                 axis=0)                                          # (3, 1, D)
  wres = params['wres'].astype(cdt)                               # (D, D)
  bres = params['bres']                                           # (1, D)
  ln = jnp.concatenate([params['gamma'], params['beta']], axis=0)  # (2, D)

  in_specs = [
      pl.BlockSpec((Nb, S, D), lambda n: (n, 0, 0)),              # x
      pl.BlockSpec((2, D), lambda n: (0, 0)),                     # LN gamma/beta
      pl.BlockSpec((D, 3 * HID), lambda n: (0, 0)),               # fused W1
      pl.BlockSpec((1, 3 * HID), lambda n: (0, 0)),               # fused b1
      pl.BlockSpec((3, HID, D), lambda n: (0, 0, 0)),             # stacked W2
      pl.BlockSpec((3, 1, D), lambda n: (0, 0, 0)),               # stacked b2
      pl.BlockSpec((D, D), lambda n: (0, 0)),                     # Wres
      pl.BlockSpec((1, D), lambda n: (0, 0)),                     # bres
  ]

  kernel = functools.partial(self_attn_block_kernel, heads=heads)
  return pl.pallas_call(
      kernel,
      out_shape=jax.ShapeDtypeStruct((N, S, D), jnp.float32),
      grid=(N // Nb,),
      in_specs=in_specs,
      out_specs=pl.BlockSpec((Nb, S, D), lambda n: (n, 0, 0)),
      scratch_shapes=[pltpu.VMEM((M, D), cdt)],                   # head-merge stage
      compiler_params=pltpu.CompilerParams(
          dimension_semantics=("parallel",),
          vmem_limit_bytes=vmem_limit_bytes),
  )(x, ln, w1, b1, w2, b2, wres, bres)


def reference(x, p, heads):
  """Pure-JAX f32 replica of SelfAttentionBlock.forward for validation."""
  N, S, D = x.shape
  Dh = D // heads
  mu = x.mean(-1, keepdims=True)
  var = ((x - mu) ** 2).mean(-1, keepdims=True)
  xn = (x - mu) / jnp.sqrt(var + 1e-5) * p['gamma'][0] + p['beta'][0]

  def two(w1, b1, w2, b2):
    h = jax.nn.silu(xn @ w1 + b1[0])
    return h @ w2 + b2[0]

  q = two(p['wq1'], p['bq1'], p['wq2'], p['bq2'])
  k = two(p['wk1'], p['bk1'], p['wk2'], p['bk2'])
  v = two(p['wv1'], p['bv1'], p['wv2'], p['bv2'])

  qh = q.reshape(N, S, heads, Dh).transpose(0, 2, 1, 3)
  kh = k.reshape(N, S, heads, Dh).transpose(0, 2, 1, 3)
  vh = v.reshape(N, S, heads, Dh).transpose(0, 2, 1, 3)
  s = jnp.einsum('nhqd,nhkd->nhqk', qh, kh) / Dh ** 0.5
  mask = jnp.triu(jnp.ones((S, S), jnp.float32), 1)[None, None]
  sm = s * (1 - mask) + 2000000000.0 * mask
  sm = jnp.where(sm >= 2000000000.0, -jnp.inf, sm)
  pr = jax.nn.softmax(sm, axis=-1)
  a = jnp.einsum('nhqk,nhkd->nhqd', pr, vh).transpose(0, 2, 1, 3).reshape(N, S, D)
  y = a @ p['wres'] + p['bres'][0] + x
  return jax.nn.silu(y)


def make_params(key, in_dim, hidden_dim):
  ks = jax.random.split(key, 16)

  def lin_w(k, fin, fout):
    return (jax.random.normal(k, (fin, fout), jnp.float32)
            / jnp.sqrt(jnp.float32(fin)))

  def lin_b(k, fout):
    return 0.01 * jax.random.normal(k, (1, fout), jnp.float32)

  return {
      'gamma': jnp.ones((1, in_dim), jnp.float32),
      'beta': jnp.zeros((1, in_dim), jnp.float32),
      'wq1': lin_w(ks[0], in_dim, hidden_dim), 'bq1': lin_b(ks[1], hidden_dim),
      'wq2': lin_w(ks[2], hidden_dim, in_dim), 'bq2': lin_b(ks[3], in_dim),
      'wk1': lin_w(ks[4], in_dim, hidden_dim), 'bk1': lin_b(ks[5], hidden_dim),
      'wk2': lin_w(ks[6], hidden_dim, in_dim), 'bk2': lin_b(ks[7], in_dim),
      'wv1': lin_w(ks[8], in_dim, hidden_dim), 'bv1': lin_b(ks[9], hidden_dim),
      'wv2': lin_w(ks[10], hidden_dim, in_dim), 'bv2': lin_b(ks[11], in_dim),
      'wres': lin_w(ks[12], in_dim, in_dim), 'bres': lin_b(ks[13], in_dim),
  }


if __name__ == "__main__":
  # Small shapes: batch=2, seq=8, in_dim=32, hidden_dim=64, heads=4
  N, S, D, HIDDEN, HEADS = 2, 8, 32, 64, 4

  root = jax.random.PRNGKey(0)
  kx, kp = jax.random.split(root)
  x = jax.random.normal(kx, (N, S, D), jnp.float32)
  params = make_params(kp, D, HIDDEN)

  ref = reference(x, params, HEADS)

  # Exact-semantics check: f32 MXU operands.
  out_f32 = jax.block_until_ready(
      self_attention_block(x, params, HEADS, compute_dtype=jnp.float32))
  np.testing.assert_allclose(np.asarray(out_f32), np.asarray(ref),
                             rtol=1e-3, atol=1e-3)

  # Fast path: bf16 MXU operands, f32 accumulation (looser tolerance expected).
  out_bf16 = jax.block_until_ready(
      self_attention_block(x, params, HEADS, compute_dtype=jnp.bfloat16))
  np.testing.assert_allclose(np.asarray(out_bf16), np.asarray(ref),
                             rtol=5e-2, atol=5e-2)

  print("KERNEL_OK")
</pallas_src>

<mosaic_0001>
module attributes {stable_mosaic.version = 11 : i64} {
  func.func @self_attn_block_kernel(%arg0: i32, %arg1: memref<1x8x32xf32, #tpu.memory_space<vmem>>, %arg2: memref<2x32xf32, #tpu.memory_space<vmem>>, %arg3: memref<32x192xf32, #tpu.memory_space<vmem>>, %arg4: memref<1x192xf32, #tpu.memory_space<vmem>>, %arg5: memref<3x64x32xf32, #tpu.memory_space<vmem>>, %arg6: memref<3x1x32xf32, #tpu.memory_space<vmem>>, %arg7: memref<32x32xf32, #tpu.memory_space<vmem>>, %arg8: memref<1x32xf32, #tpu.memory_space<vmem>>, %arg9: memref<1x8x32xf32, #tpu.memory_space<vmem>>, %arg10: memref<8x32xf32, #tpu.memory_space<vmem>>) attributes {dimension_semantics = [#tpu.dimension_semantics<parallel>], iteration_bounds = array<i64: 2>, scalar_prefetch = 0 : i64, scratch_operands = 1 : i64, tpu.core_type = #tpu.core_type<tc>, window_params = [{transform_indices = @transform_0, window_bounds = array<i64: 1, 8, 32>}, {pipeline_mode = #tpu.pipeline_mode<synchronous>, transform_indices = @transform_1, window_bounds = array<i64: 2, 32>}, {pipeline_mode = #tpu.pipeline_mode<synchronous>, transform_indices = @transform_2, window_bounds = array<i64: 32, 192>}, {pipeline_mode = #tpu.pipeline_mode<synchronous>, transform_indices = @transform_3, window_bounds = array<i64: 1, 192>}, {pipeline_mode = #tpu.pipeline_mode<synchronous>, transform_indices = @transform_4, window_bounds = array<i64: 3, 64, 32>}, {pipeline_mode = #tpu.pipeline_mode<synchronous>, transform_indices = @transform_5, window_bounds = array<i64: 3, 1, 32>}, {pipeline_mode = #tpu.pipeline_mode<synchronous>, transform_indices = @transform_6, window_bounds = array<i64: 32, 32>}, {pipeline_mode = #tpu.pipeline_mode<synchronous>, transform_indices = @transform_7, window_bounds = array<i64: 1, 32>}, {transform_indices = @transform_8, window_bounds = array<i64: 1, 8, 32>}]} {
    %c0 = arith.constant 0 : index
    %c0_0 = arith.constant 0 : index
    %c0_1 = arith.constant 0 : index
    %0 = vector.load %arg1[%c0, %c0_0, %c0_1] : memref<1x8x32xf32, #tpu.memory_space<vmem>>, vector<1x8x32xf32>
    %1 = vector.shape_cast %0 : vector<1x8x32xf32> to vector<8x32xf32>
    %c0_2 = arith.constant 0 : index
    %c0_3 = arith.constant 0 : index
    %2 = vector.load %arg2[%c0_2, %c0_3] : memref<2x32xf32, #tpu.memory_space<vmem>>, vector<1x32xf32>
    %c1 = arith.constant 1 : index
    %c0_4 = arith.constant 0 : index
    %3 = vector.load %arg2[%c1, %c0_4] : memref<2x32xf32, #tpu.memory_space<vmem>>, vector<1x32xf32>
    %cst = arith.constant dense<0.000000e+00> : vector<8xf32>
    %4 = vector.multi_reduction <add>, %1, %cst [1] : vector<8x32xf32> to vector<8xf32>
    %5 = vector.shape_cast %4 : vector<8xf32> to vector<8x1xf32>
    %cst_5 = arith.constant 3.200000e+01 : f32
    %6 = vector.broadcast %cst_5 : f32 to vector<8x1xf32>
    %7 = arith.divf %5, %6 : vector<8x1xf32>
    %8 = vector.broadcast %7 : vector<8x1xf32> to vector<8x32xf32>
    %9 = arith.subf %1, %8 : vector<8x32xf32>
    %10 = arith.mulf %9, %9 : vector<8x32xf32>
    %cst_6 = arith.constant dense<0.000000e+00> : vector<8xf32>
    %11 = vector.multi_reduction <add>, %10, %cst_6 [1] : vector<8x32xf32> to vector<8xf32>
    %12 = vector.shape_cast %11 : vector<8xf32> to vector<8x1xf32>
    %cst_7 = arith.constant 3.200000e+01 : f32
    %13 = vector.broadcast %cst_7 : f32 to vector<8x1xf32>
    %14 = arith.divf %12, %13 : vector<8x1xf32>
    %15 = vector.broadcast %7 : vector<8x1xf32> to vector<8x32xf32>
    %16 = arith.subf %1, %15 : vector<8x32xf32>
    %cst_8 = arith.constant 9.99999974E-6 : f32
    %17 = vector.broadcast %cst_8 : f32 to vector<8x1xf32>
    %18 = arith.addf %14, %17 : vector<8x1xf32>
    %19 = math.rsqrt %18 : vector<8x1xf32>
    %20 = vector.broadcast %19 : vector<8x1xf32> to vector<8x32xf32>
    %21 = arith.mulf %16, %20 : vector<8x32xf32>
    %22 = vector.broadcast %2 : vector<1x32xf32> to vector<8x32xf32>
    %23 = arith.mulf %21, %22 : vector<8x32xf32>
    %24 = vector.broadcast %3 : vector<1x32xf32> to vector<8x32xf32>
    %25 = arith.addf %23, %24 : vector<8x32xf32>
    %c0_9 = arith.constant 0 : index
    %c0_10 = arith.constant 0 : index
    %26 = vector.load %arg3[%c0_9, %c0_10] : memref<32x192xf32, #tpu.memory_space<vmem>>, vector<32x192xf32>
    %cst_11 = arith.constant dense<0.000000e+00> : vector<8x192xf32>
    %27 = tpu.matmul %25, %26, %cst_11 {dimension_numbers = #tpu.dot_dimension_numbers<[1], [0], [0], [1], [0, 0, 1, 1], [], []>} : vector<8x32xf32>, vector<32x192xf32>, vector<8x192xf32> -> vector<8x192xf32>
    %c0_12 = arith.constant 0 : index
    %c0_13 = arith.constant 0 : index
    %28 = vector.load %arg4[%c0_12, %c0_13] : memref<1x192xf32, #tpu.memory_space<vmem>>, vector<1x192xf32>
    %29 = vector.broadcast %28 : vector<1x192xf32> to vector<8x192xf32>
    %30 = arith.addf %27, %29 : vector<8x192xf32>
    %31 = arith.negf %30 : vector<8x192xf32>
    %32 = math.exp %31 : vector<8x192xf32>
    %cst_14 = arith.constant 1.000000e+00 : f32
    %33 = vector.broadcast %cst_14 : f32 to vector<8x192xf32>
    %34 = arith.addf %33, %32 : vector<8x192xf32>
    %35 = arith.divf %33, %34 : vector<8x192xf32>
    %36 = arith.mulf %30, %35 : vector<8x192xf32>
    %37 = vector.extract_strided_slice %36 {offsets = [0, 0], sizes = [8, 64], strides = [1, 1]} : vector<8x192xf32> to vector<8x64xf32>
    %c0_15 = arith.constant 0 : index
    %c0_16 = arith.constant 0 : index
    %c0_17 = arith.constant 0 : index
    %38 = vector.load %arg5[%c0_15, %c0_16, %c0_17] : memref<3x64x32xf32, #tpu.memory_space<vmem>>, vector<1x64x32xf32>
    %39 = vector.shape_cast %38 : vector<1x64x32xf32> to vector<64x32xf32>
    %cst_18 = arith.constant dense<0.000000e+00> : vector<8x32xf32>
    %40 = tpu.matmul %37, %39, %cst_18 {dimension_numbers = #tpu.dot_dimension_numbers<[1], [0], [0], [1], [0, 0, 1, 1], [], []>} : vector<8x64xf32>, vector<64x32xf32>, vector<8x32xf32> -> vector<8x32xf32>
    %c0_19 = arith.constant 0 : index
    %c0_20 = arith.constant 0 : index
    %c0_21 = arith.constant 0 : index
    %41 = vector.load %arg6[%c0_19, %c0_20, %c0_21] : memref<3x1x32xf32, #tpu.memory_space<vmem>>, vector<1x1x32xf32>
    %42 = vector.shape_cast %41 : vector<1x1x32xf32> to vector<1x32xf32>
    %43 = vector.broadcast %42 : vector<1x32xf32> to vector<8x32xf32>
    %44 = arith.addf %40, %43 : vector<8x32xf32>
    %cst_22 = arith.constant 0.353553385 : f32
    %45 = vector.broadcast %cst_22 : f32 to vector<8x32xf32>
    %46 = arith.mulf %44, %45 : vector<8x32xf32>
    %47 = vector.extract_strided_slice %36 {offsets = [0, 64], sizes = [8, 64], strides = [1, 1]} : vector<8x192xf32> to vector<8x64xf32>
    %c1_23 = arith.constant 1 : index
    %c0_24 = arith.constant 0 : index
    %c0_25 = arith.constant 0 : index
    %48 = vector.load %arg5[%c1_23, %c0_24, %c0_25] : memref<3x64x32xf32, #tpu.memory_space<vmem>>, vector<1x64x32xf32>
    %49 = vector.shape_cast %48 : vector<1x64x32xf32> to vector<64x32xf32>
    %cst_26 = arith.constant dense<0.000000e+00> : vector<8x32xf32>
    %50 = tpu.matmul %47, %49, %cst_26 {dimension_numbers = #tpu.dot_dimension_numbers<[1], [0], [0], [1], [0, 0, 1, 1], [], []>} : vector<8x64xf32>, vector<64x32xf32>, vector<8x32xf32> -> vector<8x32xf32>
    %c1_27 = arith.constant 1 : index
    %c0_28 = arith.constant 0 : index
    %c0_29 = arith.constant 0 : index
    %51 = vector.load %arg6[%c1_27, %c0_28, %c0_29] : memref<3x1x32xf32, #tpu.memory_space<vmem>>, vector<1x1x32xf32>
    %52 = vector.shape_cast %51 : vector<1x1x32xf32> to vector<1x32xf32>
    %53 = vector.broadcast %52 : vector<1x32xf32> to vector<8x32xf32>
    %54 = arith.addf %50, %53 : vector<8x32xf32>
    %55 = vector.extract_strided_slice %36 {offsets = [0, 128], sizes = [8, 64], strides = [1, 1]} : vector<8x192xf32> to vector<8x64xf32>
    %c2 = arith.constant 2 : index
    %c0_30 = arith.constant 0 : index
    %c0_31 = arith.constant 0 : index
    %56 = vector.load %arg5[%c2, %c0_30, %c0_31] : memref<3x64x32xf32, #tpu.memory_space<vmem>>, vector<1x64x32xf32>
    %57 = vector.shape_cast %56 : vector<1x64x32xf32> to vector<64x32xf32>
    %cst_32 = arith.constant dense<0.000000e+00> : vector<8x32xf32>
    %58 = tpu.matmul %55, %57, %cst_32 {dimension_numbers = #tpu.dot_dimension_numbers<[1], [0], [0], [1], [0, 0, 1, 1], [], []>} : vector<8x64xf32>, vector<64x32xf32>, vector<8x32xf32> -> vector<8x32xf32>
    %c2_33 = arith.constant 2 : index
    %c0_34 = arith.constant 0 : index
    %c0_35 = arith.constant 0 : index
    %59 = vector.load %arg6[%c2_33, %c0_34, %c0_35] : memref<3x1x32xf32, #tpu.memory_space<vmem>>, vector<1x1x32xf32>
    %60 = vector.shape_cast %59 : vector<1x1x32xf32> to vector<1x32xf32>
    %61 = vector.broadcast %60 : vector<1x32xf32> to vector<8x32xf32>
    %62 = arith.addf %58, %61 : vector<8x32xf32>
    %63 = vector.extract_strided_slice %46 {offsets = [0, 0], sizes = [8, 8], strides = [1, 1]} : vector<8x32xf32> to vector<8x8xf32>
    %64 = vector.shape_cast %63 : vector<8x8xf32> to vector<1x8x8xf32>
    %65 = vector.extract_strided_slice %46 {offsets = [0, 8], sizes = [8, 8], strides = [1, 1]} : vector<8x32xf32> to vector<8x8xf32>
    %66 = vector.shape_cast %65 : vector<8x8xf32> to vector<1x8x8xf32>
    %67 = vector.extract_strided_slice %46 {offsets = [0, 16], sizes = [8, 8], strides = [1, 1]} : vector<8x32xf32> to vector<8x8xf32>
    %68 = vector.shape_cast %67 : vector<8x8xf32> to vector<1x8x8xf32>
    %69 = vector.extract_strided_slice %46 {offsets = [0, 24], sizes = [8, 8], strides = [1, 1]} : vector<8x32xf32> to vector<8x8xf32>
    %70 = vector.shape_cast %69 : vector<8x8xf32> to vector<1x8x8xf32>
    %71 = tpu.concatenate %64, %66, %68, %70 in 0 : vector<1x8x8xf32>, vector<1x8x8xf32>, vector<1x8x8xf32>, vector<1x8x8xf32> -> vector<4x8x8xf32>
    %72 = vector.extract_strided_slice %54 {offsets = [0, 0], sizes = [8, 8], strides = [1, 1]} : vector<8x32xf32> to vector<8x8xf32>
    %73 = vector.shape_cast %72 : vector<8x8xf32> to vector<1x8x8xf32>
    %74 = vector.extract_strided_slice %54 {offsets = [0, 8], sizes = [8, 8], strides = [1, 1]} : vector<8x32xf32> to vector<8x8xf32>
    %75 = vector.shape_cast %74 : vector<8x8xf32> to vector<1x8x8xf32>
    %76 = vector.extract_strided_slice %54 {offsets = [0, 16], sizes = [8, 8], strides = [1, 1]} : vector<8x32xf32> to vector<8x8xf32>
    %77 = vector.shape_cast %76 : vector<8x8xf32> to vector<1x8x8xf32>
    %78 = vector.extract_strided_slice %54 {offsets = [0, 24], sizes = [8, 8], strides = [1, 1]} : vector<8x32xf32> to vector<8x8xf32>
    %79 = vector.shape_cast %78 : vector<8x8xf32> to vector<1x8x8xf32>
    %80 = tpu.concatenate %73, %75, %77, %79 in 0 : vector<1x8x8xf32>, vector<1x8x8xf32>, vector<1x8x8xf32>, vector<1x8x8xf32> -> vector<4x8x8xf32>
    %81 = vector.extract_strided_slice %62 {offsets = [0, 0], sizes = [8, 8], strides = [1, 1]} : vector<8x32xf32> to vector<8x8xf32>
    %82 = vector.shape_cast %81 : vector<8x8xf32> to vector<1x8x8xf32>
    %83 = vector.extract_strided_slice %62 {offsets = [0, 8], sizes = [8, 8], strides = [1, 1]} : vector<8x32xf32> to vector<8x8xf32>
    %84 = vector.shape_cast %83 : vector<8x8xf32> to vector<1x8x8xf32>
    %85 = vector.extract_strided_slice %62 {offsets = [0, 16], sizes = [8, 8], strides = [1, 1]} : vector<8x32xf32> to vector<8x8xf32>
    %86 = vector.shape_cast %85 : vector<8x8xf32> to vector<1x8x8xf32>
    %87 = vector.extract_strided_slice %62 {offsets = [0, 24], sizes = [8, 8], strides = [1, 1]} : vector<8x32xf32> to vector<8x8xf32>
    %88 = vector.shape_cast %87 : vector<8x8xf32> to vector<1x8x8xf32>
    %89 = tpu.concatenate %82, %84, %86, %88 in 0 : vector<1x8x8xf32>, vector<1x8x8xf32>, vector<1x8x8xf32>, vector<1x8x8xf32> -> vector<4x8x8xf32>
    %cst_36 = arith.constant dense<0.000000e+00> : vector<4x8x8xf32>
    %90 = tpu.matmul %71, %80, %cst_36 {dimension_numbers = #tpu.dot_dimension_numbers<[2], [2], [1], [1], [0, 0, 0, 1, 1, 1], [0], [0]>} : vector<4x8x8xf32>, vector<4x8x8xf32>, vector<4x8x8xf32> -> vector<4x8x8xf32>
    %91 = tpu.iota {dimensions = array<i32: 0>} : vector<8x8xi32>
    %92 = tpu.iota {dimensions = array<i32: 1>} : vector<8x8xi32>
    %93 = arith.cmpi sle, %92, %91 : vector<8x8xi32>
    %94 = vector.shape_cast %93 : vector<8x8xi1> to vector<1x8x8xi1>
    %cst_37 = arith.constant -1.000000e+30 : f32
    %95 = vector.shape_cast %94 : vector<1x8x8xi1> to vector<1x8x8xi1>
    %96 = vector.broadcast %95 : vector<1x8x8xi1> to vector<4x8x8xi1>
    %97 = vector.broadcast %cst_37 : f32 to vector<4x8x8xf32>
    %98 = arith.select %96, %90, %97 : vector<4x8x8xi1>, vector<4x8x8xf32>
    %cst_38 = arith.constant dense<0xFF800000> : vector<4x8xf32>
    %99 = vector.multi_reduction <maximumf>, %98, %cst_38 [2] : vector<4x8x8xf32> to vector<4x8xf32>
    %100 = vector.shape_cast %99 : vector<4x8xf32> to vector<4x8x1xf32>
    %101 = vector.broadcast %100 : vector<4x8x1xf32> to vector<4x8x8xf32>
    %102 = arith.subf %98, %101 : vector<4x8x8xf32>
    %103 = math.exp %102 : vector<4x8x8xf32>
    %cst_39 = arith.constant dense<0.000000e+00> : vector<4x8xf32>
    %104 = vector.multi_reduction <add>, %103, %cst_39 [2] : vector<4x8x8xf32> to vector<4x8xf32>
    %105 = vector.shape_cast %104 : vector<4x8xf32> to vector<4x8x1xf32>
    %106 = vector.broadcast %105 : vector<4x8x1xf32> to vector<4x8x8xf32>
    %107 = arith.divf %103, %106 : vector<4x8x8xf32>
    %cst_40 = arith.constant dense<0.000000e+00> : vector<4x8x8xf32>
    %108 = tpu.matmul %107, %89, %cst_40 {dimension_numbers = #tpu.dot_dimension_numbers<[2], [1], [1], [2], [0, 0, 0, 1, 1, 2], [0], [0]>} : vector<4x8x8xf32>, vector<4x8x8xf32>, vector<4x8x8xf32> -> vector<4x8x8xf32>
    %109 = vector.extract_strided_slice %108 {offsets = [0, 0, 0], sizes = [1, 8, 8], strides = [1, 1, 1]} : vector<4x8x8xf32> to vector<1x8x8xf32>
    %110 = vector.shape_cast %109 : vector<1x8x8xf32> to vector<8x8xf32>
    %c0_41 = arith.constant 0 : index
    %c0_42 = arith.constant 0 : index
    %111 = vector.load %arg10[%c0_41, %c0_42] : memref<8x32xf32, #tpu.memory_space<vmem>>, vector<8x8xf32>
    tpu.vector_store %arg10[%c0_41, %c0_42], %110 {strides = array<i32>} : memref<8x32xf32, #tpu.memory_space<vmem>>, vector<8x8xf32>,
    %112 = vector.extract_strided_slice %108 {offsets = [1, 0, 0], sizes = [1, 8, 8], strides = [1, 1, 1]} : vector<4x8x8xf32> to vector<1x8x8xf32>
    %113 = vector.shape_cast %112 : vector<1x8x8xf32> to vector<8x8xf32>
    %c0_43 = arith.constant 0 : index
    %c8 = arith.constant 8 : index
    %114 = vector.load %arg10[%c0_43, %c8] : memref<8x32xf32, #tpu.memory_space<vmem>>, vector<8x8xf32>
    tpu.vector_store %arg10[%c0_43, %c8], %113 {strides = array<i32>} : memref<8x32xf32, #tpu.memory_space<vmem>>, vector<8x8xf32>,
    %115 = vector.extract_strided_slice %108 {offsets = [2, 0, 0], sizes = [1, 8, 8], strides = [1, 1, 1]} : vector<4x8x8xf32> to vector<1x8x8xf32>
    %116 = vector.shape_cast %115 : vector<1x8x8xf32> to vector<8x8xf32>
    %c0_44 = arith.constant 0 : index
    %c16 = arith.constant 16 : index
    %117 = vector.load %arg10[%c0_44, %c16] : memref<8x32xf32, #tpu.memory_space<vmem>>, vector<8x8xf32>
    tpu.vector_store %arg10[%c0_44, %c16], %116 {strides = array<i32>} : memref<8x32xf32, #tpu.memory_space<vmem>>, vector<8x8xf32>,
    %118 = vector.extract_strided_slice %108 {offsets = [3, 0, 0], sizes = [1, 8, 8], strides = [1, 1, 1]} : vector<4x8x8xf32> to vector<1x8x8xf32>
    %119 = vector.shape_cast %118 : vector<1x8x8xf32> to vector<8x8xf32>
    %c0_45 = arith.constant 0 : index
    %c24 = arith.constant 24 : index
    %120 = vector.load %arg10[%c0_45, %c24] : memref<8x32xf32, #tpu.memory_space<vmem>>, vector<8x8xf32>
    tpu.vector_store %arg10[%c0_45, %c24], %119 {strides = array<i32>} : memref<8x32xf32, #tpu.memory_space<vmem>>, vector<8x8xf32>,
    %c0_46 = arith.constant 0 : index
    %c0_47 = arith.constant 0 : index
    %121 = vector.load %arg10[%c0_46, %c0_47] : memref<8x32xf32, #tpu.memory_space<vmem>>, vector<8x32xf32>
    %c0_48 = arith.constant 0 : index
    %c0_49 = arith.constant 0 : index
    %122 = vector.load %arg7[%c0_48, %c0_49] : memref<32x32xf32, #tpu.memory_space<vmem>>, vector<32x32xf32>
    %cst_50 = arith.constant dense<0.000000e+00> : vector<8x32xf32>
    %123 = tpu.matmul %121, %122, %cst_50 {dimension_numbers = #tpu.dot_dimension_numbers<[1], [0], [0], [1], [0, 0, 1, 1], [], []>} : vector<8x32xf32>, vector<32x32xf32>, vector<8x32xf32> -> vector<8x32xf32>
    %c0_51 = arith.constant 0 : index
    %c0_52 = arith.constant 0 : index
    %124 = vector.load %arg8[%c0_51, %c0_52] : memref<1x32xf32, #tpu.memory_space<vmem>>, vector<1x32xf32>
    %125 = vector.broadcast %124 : vector<1x32xf32> to vector<8x32xf32>
    %126 = arith.addf %123, %125 : vector<8x32xf32>
    %127 = arith.addf %126, %1 : vector<8x32xf32>
    %128 = arith.negf %127 : vector<8x32xf32>
    %129 = math.exp %128 : vector<8x32xf32>
    %cst_53 = arith.constant 1.000000e+00 : f32
    %130 = vector.broadcast %cst_53 : f32 to vector<8x32xf32>
    %131 = arith.addf %130, %129 : vector<8x32xf32>
    %132 = arith.divf %130, %131 : vector<8x32xf32>
    %133 = arith.mulf %127, %132 : vector<8x32xf32>
    %134 = vector.shape_cast %133 : vector<8x32xf32> to vector<1x8x32xf32>
    %c0_54 = arith.constant 0 : index
    %c0_55 = arith.constant 0 : index
    %c0_56 = arith.constant 0 : index
    %135 = vector.load %arg9[%c0_54, %c0_55, %c0_56] : memref<1x8x32xf32, #tpu.memory_space<vmem>>, vector<1x8x32xf32>
    tpu.vector_store %arg9[%c0_54, %c0_55, %c0_56], %134 {strides = array<i32>} : memref<1x8x32xf32, #tpu.memory_space<vmem>>, vector<1x8x32xf32>,
    return
  }
  func.func @transform_0(%arg0: i32) -> (i32, i32, i32) {
    %c0_i32 = arith.constant 0 : i32
    %c0_i32_0 = arith.constant 0 : i32
    %c0_i32_1 = arith.constant 0 : i32
    return %arg0, %c0_i32, %c0_i32_0 : i32, i32, i32
  }
  func.func @transform_1(%arg0: i32) -> (i32, i32) {
    %c0_i32 = arith.constant 0 : i32
    %c0_i32_0 = arith.constant 0 : i32
    %c0_i32_1 = arith.constant 0 : i32
    return %c0_i32, %c0_i32_0 : i32, i32
  }
  func.func @transform_2(%arg0: i32) -> (i32, i32) {
    %c0_i32 = arith.constant 0 : i32
    %c0_i32_0 = arith.constant 0 : i32
    %c0_i32_1 = arith.constant 0 : i32
    return %c0_i32, %c0_i32_0 : i32, i32
  }
  func.func @transform_3(%arg0: i32) -> (i32, i32) {
    %c0_i32 = arith.constant 0 : i32
    %c0_i32_0 = arith.constant 0 : i32
    %c0_i32_1 = arith.constant 0 : i32
    return %c0_i32, %c0_i32_0 : i32, i32
  }
  func.func @transform_4(%arg0: i32) -> (i32, i32, i32) {
    %c0_i32 = arith.constant 0 : i32
    %c0_i32_0 = arith.constant 0 : i32
    %c0_i32_1 = arith.constant 0 : i32
    %c0_i32_2 = arith.constant 0 : i32
    return %c0_i32, %c0_i32_0, %c0_i32_1 : i32, i32, i32
  }
  func.func @transform_5(%arg0: i32) -> (i32, i32, i32) {
    %c0_i32 = arith.constant 0 : i32
    %c0_i32_0 = arith.constant 0 : i32
    %c0_i32_1 = arith.constant 0 : i32
    %c0_i32_2 = arith.constant 0 : i32
    return %c0_i32, %c0_i32_0, %c0_i32_1 : i32, i32, i32
  }
  func.func @transform_6(%arg0: i32) -> (i32, i32) {
    %c0_i32 = arith.constant 0 : i32
    %c0_i32_0 = arith.constant 0 : i32
    %c0_i32_1 = arith.constant 0 : i32
    return %c0_i32, %c0_i32_0 : i32, i32
  }
  func.func @transform_7(%arg0: i32) -> (i32, i32) {
    %c0_i32 = arith.constant 0 : i32
    %c0_i32_0 = arith.constant 0 : i32
    %c0_i32_1 = arith.constant 0 : i32
    return %c0_i32, %c0_i32_0 : i32, i32
  }
  func.func @transform_8(%arg0: i32) -> (i32, i32, i32) {
    %c0_i32 = arith.constant 0 : i32
    %c0_i32_0 = arith.constant 0 : i32
    %c0_i32_1 = arith.constant 0 : i32
    return %arg0, %c0_i32, %c0_i32_0 : i32, i32, i32
  }
}

</mosaic_0001>

<bundles_post_ra>
// kernel: tpu_custom_call.1
= control target key start
LH: loop header
LB: loop body
LE: loop exit
PB: predicated region body
PF: predicated region fallthrough
CT: control target
= control target key end

     0   :  { %13 = vsyncpa [#allocation4], 0  ;;  %s2308_s0 = inlined_call_operand.vmem [shape: f32[2,8,32], index: 0, kind: input, shape index: {}]   ;;  %s2309_s1 = inlined_call_operand.vmem [shape: f32[2,32], index: 1, kind: input, shape index: {}]   ;;  %s2310_s2 = inlined_call_operand.vmem [shape: f32[32,192], index: 2, kind: input, shape index: {}]   ;;  %s2311_s3 = inlined_call_operand.vmem [shape: f32[1,192], index: 3, kind: input, shape index: {}]   ;;  %s2312_s4 = inlined_call_operand.vmem [shape: f32[3,64,32], index: 4, kind: input, shape index: {}]   ;;  %s2313_s5 = inlined_call_operand.vmem [shape: f32[3,1,32], index: 5, kind: input, shape index: {}]   ;;  %s2314_s6 = inlined_call_operand.vmem [shape: f32[32,32], index: 6, kind: input, shape index: {}]   ;;  %s2315_s7 = inlined_call_operand.vmem [shape: f32[1,32], index: 7, kind: input, shape index: {}]   ;;  %s2316_s8 = inlined_call_operand.hbm [shape: f32[2,8,32], index: 8, kind: output, shape index: {}]  }
   0x1   :  { %15 = vsyncpa [#allocation4 + $0x1], 0  ;;  %s1967_s27 = smov 0   ;;  %s1969_s28 = smov 0  }
   0x2   :  { %s1971_s29 = smov 0   ;;  %s1973_s30 = smov 0  }
   0x3 LB: > { %s1988_s9 = sadd.s32 4294967295, %s1910_s30   ;;  %s1562_s10 = sadd.s32 4294967294, %s1910_s30   ;;  %s1910_s30 = sphi %s1973_s30, %s2322_s30   ;;  %s1906_s29 = sphi %s1971_s29, %s2321_s29   ;;  %s1902_s28 = sphi %s1969_s28, %s2320_s28   ;;  %s1898_s27 = sphi %s1967_s27, %s2319_s27  }
   0x4   : > { %s1992_s11 = sadd.s32 1, %s1910_s30   ;;  %s201_s12 = sadd.s32 1, %s1906_s29 }
   0x5   : > { %s198_s13 = ssub.s32 %s1910_s30, %s1992_s11  ;;  %p211_p0 = scmp.ne.s32.totalorder %s1906_s29, %s1902_s28 }
   0x6   : > { %p199_p1 = scmp.eq.s32.totalorder %s198_s13, 0  ;;  %p212_p2 = scmp.eq.s32.totalorder %s1988_s9, 1 }
   0x7   : > { %p217_p3 = scmp.ne.s32.totalorder %s1902_s28, %s1898_s27  ;;  %p218_p4 = scmp.eq.s32.totalorder %s1562_s10, 1 }
   0x8   : > { %s2003_s14 = scalar_select %p199_p1, %s1906_s29, %s201_s12  }
   0x9   : > { %p2005_p5 = por %p212_p2, %p211_p0  ;;  %p2009_p6 = por %p218_p4, %p217_p3 }
   0xa   : > { %p1565_p7 = scmp.ge.s32.totalorder %s1910_s30, 1  ;;  %p264_p8 = scmp.lt.s32.totalorder %s1910_s30, 3 }
   0xc   : > { %p265_p9 = pnand %p1565_p7, %p264_p8 }
   0xd   : > { %p297_p10 = scmp.lt.s32.totalorder (!%p265_p9), %s1988_s9, 1  ;;  %s1914_s26 = smov (!%p265_p9), 64  }
   0xe   : > { %268 = sbr.rel (%p265_p9) target bundleno = 2064 (0x810), region = 52  ;;  %s1919_s20 = smov (!%p265_p9), 16  }
   0xf   : > { %s294_s24 = sand.u32 (!%p265_p9), 1, %s1902_s28  }
  0x10   : > { %s1566_s25 = sshll.u32 (!%p265_p9), %s294_s24, 3  ;;  %s1490_s19 = scalar_lea.sflag (!%p265_p9), [#allocation4], %s294_s24 }
  0x11   : > { %s296_s10 = scalar_lea.vmem (!%p265_p9), [#allocation3], %s1566_s25 }
  0x12   : > { %s1503_s12 = sshll.u32 (!%p265_p9), %s296_s10, 4  ;;  %s1504_s12 = int_to_ptr.vmem [resolvable:$true] %s1503_s12 }
  0x13   : > { %s298_s17 = scalar_select %p297_p10, %s1988_s9, 1  ;;  %vm304_vm0 = vcmask 261120   ;;  %v336_v7 = vld [vmem:[%s2310_s2 + $0x38] sm:$0xff]  ;;  %v335_v8 = vld [vmem:[%s2310_s2 + $0x30] sm:$0xff]  ;;  %v334_v9 = vld [vmem:[%s2310_s2 + $0x28] sm:$0xff]  ;;  %v1912_v11 = vmov 0.0   ;;  %v339_v41 = vlaneseq }
  0x14   : > { %376 = vmatprep.subr.mxu0 %v336_v7  ;;  %v333_v10 = vld [vmem:[%s2310_s2 + $0x20] sm:$0xff]  ;;  %416 = vmatprep.mubr.f32.mxu0 %v1912_v11  ;;  %v332_v12 = vld [vmem:[%s2310_s2 + $0x18] sm:$0xff]  ;;  %v331_v13 = vld [vmem:[%s2310_s2 + $0x10] sm:$0xff]  ;;  %vm1913_vm1 = vmmov 0   ;;  %vm452_vm2 = vcmask 523264   ;;  %vm732_vm3 = vcmask 64512  }
  0x15   : > { %s1567_s18 = sshll.u32 %s298_s17, 3  ;;  %377 = vmatpush1.msra.mxu0 %v335_v8  ;;  %1664 = vmatprep.subr.mxu1 %v1912_v11  ;;  %v330_v14 = vld [vmem:[%s2310_s2 + $0x8] sm:$0xff]  ;;  %v329_v15 = vld [vmem:[%s2310_s2] sm:$0xff]  ;;  %v444_v25 = vld [vmem:[%s2312_s4 + $0x38] sm:$0xff]  ;;  %v2129_v42 = vshrl.u32 %v339_v41, 7  ;;  %s1915_s17 = smov 112  }
  0x16   : > { %s300_s21 = scalar_lea.vmem %s2308_s0, %s1567_s18  ;;  %378 = vmatprep.subr.mxu0 %v334_v9  ;;  %v1568_v20 = vld [vmem:[%s2309_s1] ss:$0 sm:$0xff]  ;;  %v1569_v22 = vld [vmem:[%s2309_s1 + $0x1] ss:$0 sm:$0xff]  ;;  %1665 = vmatpush3.msra.mxu1 %v444_v25  ;;  %v443_v26 = vld [vmem:[%s2312_s4 + $0x30] sm:$0xff]  ;;  %s1916_s18 = smov 120  }
  0x17   : > { %v2020_v0 = vld [vmem:[%s300_s21] sm:$0xff]  ;;  %379 = vmatpush1.msra.mxu0 %v333_v10  ;;  %1666 = vmatprep.subr.mxu1 %v1912_v11  ;;  %v442_v27 = vld [vmem:[%s2312_s4 + $0x28] sm:$0xff]  ;;  %v440_v29 = vld [vmem:[%s2312_s4 + $0x18] sm:$0xff]  ;;  %v341_v43 = vsub.s32 0, %v2129_v42  ;;  %v345_v46 = vsub.s32 1, %v2129_v42  ;;  %s1917_s21 = smov 104  }
  0x18   : > { %v305_v1 = vsel %vm304_vm0, %v2020_v0, 0.0  ;;  %380 = vmatprep.subr.mxu0 %v332_v12  ;;  %1667 = vmatpush3.msra.mxu1 %v443_v26  ;;  %v441_v28 = vld [vmem:[%s2312_s4 + $0x20] sm:$0xff]  ;;  %v439_v30 = vld [vmem:[%s2312_s4 + $0x10] sm:$0xff]  ;;  %v438_v31 = vld [vmem:[%s2312_s4 + $0x8] sm:$0xff]  ;;  %vm1381_vm5 = vcmask 130112   ;;  %vm1387_vm6 = vcmask 195712  }
  0x19   : > { %306 = vadd.xlane.f32.xlu0 %v305_v1  ;;  %381 = vmatpush1.msra.mxu0 %v331_v13  ;;  %v437_v32 = vld [vmem:[%s2312_s4] sm:$0xff]  ;;  %v1582_v33 = vld [vmem:[%s2312_s4 + $0x78] sm:$0xff]  ;;  %v1581_v34 = vld [vmem:[%s2312_s4 + $0x70] sm:$0xff]  ;;  %vm1393_vm7 = vcmask 261312  }
  0x1a   : > { %382 = vmatprep.subr.mxu0 %v330_v14  ;;  %1668 = vmatprep.subr.mxu1 %v1912_v11  ;;  %v1580_v35 = vld [vmem:[%s2312_s4 + $0x68] sm:$0xff]  ;;  %v1579_v36 = vld [vmem:[%s2312_s4 + $0x60] sm:$0xff]  ;;  %v1578_v37 = vld [vmem:[%s2312_s4 + $0x58] sm:$0xff] }
  0x1b   : > { %383 = vmatpush1.msra.mxu0 %v329_v15  ;;  %1669 = vmatpush3.msra.mxu1 %v442_v27  ;;  %v1577_v38 = vld [vmem:[%s2312_s4 + $0x50] sm:$0xff]  ;;  %v1576_v39 = vld [vmem:[%s2312_s4 + $0x48] sm:$0xff]  ;;  %v1575_v40 = vld [vmem:[%s2312_s4 + $0x40] sm:$0xff] }
  0x1c   : > { %1683 = vmatprep.subr.mxu0 %v1912_v11  ;;  %1670 = vmatprep.subr.mxu1 %v1912_v11  ;;  %v337_v44 = vld [vmem:[%s2311_s3] sm:$0x3]  ;;  %v1593_v60 = vld [vmem:[%s2312_s4 + $0xb8] sm:$0xff]  ;;  %v1592_v61 = vld [vmem:[%s2312_s4 + $0xb0] sm:$0xff] }
  0x1d   : > { %1671 = vmatpush3.msra.mxu1 %v441_v28  ;;  %1680 = vmatprep.mubr.msk.f32.mxu1 %vm1913_vm1, %v1912_v11  ;;  %v342_v45 = vrot.slane %v337_v44, %v341_v43  ;;  %v346_v50 = vrot.slane %v337_v44, %v345_v46  ;;  %v1591_v62 = vld [vmem:[%s2312_s4 + $0xa8] sm:$0xff]  ;;  %v1590_v63 = vld [vmem:[%s2312_s4 + $0xa0] sm:$0xff]  ;;  %v1589_v1 = vld [vmem:[%s2312_s4 + $0x98] sm:$0xff]  ;;  %v1032_v28 = vand.u32 127, %v339_v41 }
  0x1e   : > { %1672 = vmatprep.subr.mxu1 %v1912_v11  ;;  %v1573_v8 = vld [vmem:[%s2313_s5] ss:$0 sm:$0xff] }
  0x1f   : > { %1673 = vmatpush3.msra.mxu1 %v440_v29  ;;  %vm1033_vm4 = vcmp.le.s32.totalorder %v1032_v28, %v2129_v42 }
  0x20   : > { %1674 = vmatprep.subr.mxu1 %v1912_v11 }
  0x21   : > { %1675 = vmatpush3.msra.mxu1 %v439_v30 }
  0x22   : > { %1676 = vmatprep.subr.mxu1 %v1912_v11 }
  0x23   : > { %1677 = vmatpush3.msra.mxu1 %v438_v31 }
  0x24   : > { %1678 = vmatprep.subr.mxu1 %v1912_v11 }
  0x25   : > { %1679 = vmatpush3.msra.mxu1 %v437_v32 }
  0x26   : > { %1702 = vmatprep.subr.mxu1 %v1912_v11 }
  0xa2   : > { %v307_v2 = vpop.xlane.xlu0 %306 }
  0xa3   : > { %v309_v3 = vmul.f32 0.03125, %v307_v2  ;;  %v1588_v2 = vld [vmem:[%s2312_s4 + $0x90] sm:$0xff] }
  0xa5   : > { %v310_v4 = vsub.f32 %v2020_v0, %v309_v3  ;;  %v1587_v3 = vld [vmem:[%s2312_s4 + $0x88] sm:$0xff] }
  0xa7   : > { %v311_v5 = vmul.f32 %v310_v4, %v310_v4 }
  0xa9   : > { %v312_v6 = vsel %vm304_vm0, %v311_v5, 0.0  ;;  %v1586_v5 = vld [vmem:[%s2312_s4 + $0x80] sm:$0xff] }
  0xaa   : > { %313 = vadd.xlane.f32.xlu0 %v312_v6 }
 0x133   : > { %v314_v16 = vpop.xlane.xlu0 %313 }
 0x134   : > { %v315_v17 = vmul.f32 0.03125, %v314_v16  ;;  %v1584_v16 = vld [vmem:[%s2313_s5 + $0x1] ss:$0 sm:$0xff] }
 0x136   : > { %v316_v18 = vadd.f32 1e-05, %v315_v17 }
 0x138   : > { %1820 = vrsqrt.f32 %v316_v18 }
 0x145   : > { %v1821_v19 = vpop.eup %1820 }
 0x146   : > { %v318_v21 = vmul.f32 %v1821_v19, %v310_v4 }
 0x148   : > { %v323_v23 = vmul.f32 %v1568_v20, %v318_v21 }
 0x14a   : > { %v328_v24 = vadd.f32 %v1569_v22, %v323_v23  ;;  %v1595_v23 = vld [vmem:[%s2313_s5 + $0x2] ss:$0 sm:$0xff] }
 0x14c   : > { %1570 = vmatmul.mubr.msk.f32.vlgmr.msra.gmra.mxu0 %vm304_vm0, %v328_v24 }
 0x14d   : > { %1699 = vmatprep.mubr.msk.f32.mxu0 %vm1913_vm1, %v1912_v11  ;;  %1684 = vmatpush3.msra.mxu0 %v1582_v33 }
 0x14e   : > { %1685 = vmatprep.subr.mxu0 %v1912_v11 }
 0x14f   : > { %1686 = vmatpush3.msra.mxu0 %v1581_v34 }
 0x150   : > { %1687 = vmatprep.subr.mxu0 %v1912_v11 }
 0x151   : > { %1688 = vmatpush3.msra.mxu0 %v1580_v35 }
 0x152   : > { %1689 = vmatprep.subr.mxu0 %v1912_v11 }
 0x153   : > { %1690 = vmatpush3.msra.mxu0 %v1579_v36 }
 0x154   : > { %1691 = vmatprep.subr.mxu0 %v1912_v11 }
 0x155   : > { %1692 = vmatpush3.msra.mxu0 %v1578_v37 }
 0x156   : > { %1693 = vmatprep.subr.mxu0 %v1912_v11 }
 0x157   : > { %1694 = vmatpush3.msra.mxu0 %v1577_v38 }
 0x158   : > { %1695 = vmatprep.subr.mxu0 %v1912_v11 }
 0x159   : > { %1696 = vmatpush3.msra.mxu0 %v1576_v39 }
 0x15a   : > { %1697 = vmatprep.subr.mxu0 %v1912_v11 }
 0x15b   : > { %1698 = vmatpush3.msra.mxu0 %v1575_v40 }
 0x15c   : > { %1726 = vmatprep.subr.mxu0 %v1912_v11 }
 0x20c   : > { %v418_v47 = vpop.f32.mrf.mxu0 }
 0x20d   : > { %v419_v48 = vadd.f32 %v418_v47, %v342_v45 }
 0x20e   : > { %v420_v51 = vpop.f32.mrf.mxu0 }
 0x20f   : > { %v1571_v49 = vmul.f32 -1.442695, %v419_v48  ;;  %v421_v52 = vadd.f32 %v420_v51, %v346_v50 }
 0x211   : > { %1822 = vpow2.f32 %v1571_v49  ;;  %v1572_v53 = vmul.f32 -1.442695, %v421_v52 }
 0x213   : > { %1824 = vpow2.f32 %v1572_v53 }
 0x21e   : > { %v1823_v54 = vpop.eup %1822 }
 0x21f   : > { %v429_v55 = vadd.f32 1.0, %v1823_v54 }
 0x220   : > { %v1825_v56 = vpop.eup %1824 }
 0x221   : > { %1826 = vrcp.f32 %v429_v55  ;;  %v430_v57 = vadd.f32 1.0, %v1825_v56 }
 0x223   : > { %1828 = vrcp.f32 %v430_v57 }
 0x22e   : > { %v1827_v58 = vpop.eup %1826 }
 0x22f   : > { %v435_v59 = vmul.f32 %v1827_v58, %v419_v48 }
 0x230   : > { %v1829_v4 = vpop.eup %1828 }
 0x231   : > { %544 = vrot.lane.b32.xlu1 %v435_v59, %s1914_s26  ;;  %1681 = vmatmul.mubr.msk.f32.vlgmr.msra.gmra.mxu1 %vm452_vm2, %v435_v59  ;;  %v436_v6 = vmul.f32 %v1829_v4, %v421_v52  ;;  %s1613_s26 = sshll.u32 %s1988_s9, 7 }
 0x232   : > { %1703 = vmatpush3.msra.mxu1 %v1593_v60  ;;  %1718 = vmatprep.mubr.msk.f32.mxu1 %vm1913_vm1, %v1912_v11 }
 0x233   : > { %1704 = vmatprep.subr.mxu1 %v1912_v11 }
 0x234   : > { %1705 = vmatpush3.msra.mxu1 %v1592_v61 }
 0x235   : > { %1706 = vmatprep.subr.mxu1 %v1912_v11 }
 0x236   : > { %1707 = vmatpush3.msra.mxu1 %v1591_v62 }
 0x237   : > { %1708 = vmatprep.subr.mxu1 %v1912_v11 }
 0x238   : > { %1709 = vmatpush3.msra.mxu1 %v1590_v63 }
 0x239   : > { %1710 = vmatprep.subr.mxu1 %v1912_v11 }
 0x23a   : > { %1711 = vmatpush3.msra.mxu1 %v1589_v1 }
 0x23b   : > { %1712 = vmatprep.subr.mxu1 %v1912_v11 }
 0x23c   : > { %1713 = vmatpush3.msra.mxu1 %v1588_v2 }
 0x23d   : > { %1714 = vmatprep.subr.mxu1 %v1912_v11 }
 0x23e   : > { %1715 = vmatpush3.msra.mxu1 %v1587_v3 }
 0x23f   : > { %1716 = vmatprep.subr.mxu1 %v1912_v11 }
 0x240   : > { %1717 = vmatpush3.msra.mxu1 %v1586_v5 }
 0x241   : > { %1719 = vmatmul.mubr.msk.f32.vlgmr.msra.gmra.mxu1 %vm452_vm2, %v436_v6  ;;  %1721 = vmatprep.subr.mxu1 %v1912_v11 }
 0x242   : > { %1723 = vmatprep.mubr.msk.f32.mxu1 %vm1913_vm1, %v1912_v11 }
 0x2a3   : > { %v545_v7 = vpop.permute.xlu1 %544 }
 0x2a4   : > { %1700 = vmatmul.mubr.msk.f32.vlgmr.msra.gmra.mxu0 %vm452_vm2, %v545_v7 }
 0x2a5   : > { %1728 = vmatprep.mubr.msk.f32.mxu0 %vm1913_vm1, %v1912_v11 }
 0x2f1   : > { %v522_v9 = vpop.f32.mrf.mxu1 }
 0x2f2   : > { %v523_v10 = vadd.f32 %v1573_v8, %v522_v9 }
 0x2f3   : > { %v1682_v12 = vpop.f32.mrf.mxu1 }
 0x2f4   : > { %v526_v13 = vmul.f32 0.35355338, %v523_v10 }
 0x2f6   : > { %711 = vrot.lane.b32.xlu1 %v526_v13, %s1915_s17  ;;  %709 = vrot.lane.b32.xlu0 %v526_v13, %s1916_s18 }
 0x301   : > { %v704_v14 = vpop.f32.mrf.mxu1 }
 0x302   : > { %v2204_v25 = vadd.f32 %v1595_v23, %v704_v14 }
 0x303   : > { %v1720_v15 = vpop.f32.mrf.mxu1 }
 0x364   : > { %v614_v17 = vpop.f32.mrf.mxu0 }
 0x365   : > { %v615_v18 = vadd.f32 %v1584_v16, %v614_v17 }
 0x366   : > { %v1701_v19 = vpop.f32.mrf.mxu0 }
 0x367   : > { %1722 = vmatpush3.xpose.msk.msra.mxu1 %vm732_vm3, %v615_v18  ;;  %716 = vrot.lane.b32.xlu1 %v615_v18, %s1916_s18 }
 0x368   : > { %1736 = vmatprep.subr.mxu1 %v1912_v11  ;;  %v712_v20 = vpop.permute.xlu1 %711  ;;  %v710_v22 = vpop.permute.xlu0 %709 }
 0x36a   : > { %1724 = vmatmul.mubr.msk.f32.vlgmr.msra.gmra.mxu1 %vm732_vm3, %v526_v13 }
 0x36b   : > { %718 = vrot.lane.b32.xlu1 %v615_v18, %s1915_s17  ;;  %1738 = vmatprep.mubr.msk.f32.mxu1 %vm1913_vm1, %v1912_v11 }
 0x36f   : > { %720 = vrot.lane.b32.xlu1 %v615_v18, %s1917_s21 }
 0x373   : > { %713 = vrot.lane.b32.xlu1 %v526_v13, %s1917_s21 }
 0x3d9   : > { %v717_v21 = vpop.permute.xlu1 %716 }
 0x3da   : > { %1727 = vmatpush3.xpose.msk.msra.mxu0 %vm732_vm3, %v717_v21  ;;  %v1398_v21 = vld [vmem:[%s2314_s6 + $0x10] sm:$0xff] }
 0x3db   : > { %1731 = vmatprep.subr.mxu0 %v1912_v11 }
 0x3dd   : > { %v719_v24 = vpop.permute.xlu1 %718  ;;  %1729 = vmatmul.mubr.msk.f32.vlgmr.msra.gmra.mxu0 %vm732_vm3, %v710_v22  ;;  %v1397_v22 = vld [vmem:[%s2314_s6 + $0x8] sm:$0xff] }
 0x3de   : > { %1732 = vmatpush3.xpose.msk.msra.mxu0 %vm732_vm3, %v719_v24  ;;  %1733 = vmatprep.mubr.msk.f32.mxu0 %vm1913_vm1, %v1912_v11  ;;  %v1396_v24 = vld [vmem:[%s2314_s6] sm:$0xff] }
 0x3df   : > { %1741 = vmatprep.subr.mxu0 %v1912_v11 }
 0x3e1   : > { %v721_v26 = vpop.permute.xlu1 %720  ;;  %1734 = vmatmul.mubr.msk.f32.vlgmr.msra.gmra.mxu0 %vm732_vm3, %v712_v20  ;;  %v1399_v20 = vld [vmem:[%s2314_s6 + $0x18] sm:$0xff] }
 0x3e2   : > { %1737 = vmatpush3.xpose.msk.msra.mxu1 %vm732_vm3, %v721_v26  ;;  %1742 = vmatpush3.msra.mxu0 %v2204_v25 }
 0x3e3   : > { %1746 = vmatprep.subr.mxu1 %v1912_v11  ;;  %1743 = vmatprep.mubr.msk.f32.mxu0 %vm1913_vm1, %v1912_v11 }
 0x3e4   : > { %1751 = vmatprep.subr.mxu0 %v1912_v11 }
 0x3e5   : > { %v714_v27 = vpop.permute.xlu1 %713 }
 0x3e6   : > { %1739 = vmatmul.mubr.msk.f32.vlgmr.msra.gmra.mxu1 %vm732_vm3, %v714_v27 }
 0x3e7   : > { %1748 = vmatprep.mubr.msk.f32.mxu1 %vm1913_vm1, %v1912_v11 }
 0x42a   : > { %v803_v29 = vpop.f32.mrf.mxu1 }
 0x42b   : > { %v1036_v30 = vsel %vm1033_vm4, %v803_v29, -1e+30 }
 0x42c   : > { %v1725_v31 = vpop.f32.mrf.mxu1  ;;  %v1040_v32 = vsel %vm732_vm3, %v1036_v30, -inf }
 0x42d   : > { %1041 = vmax.xlane.f32.xlu1 %v1040_v32 }
 0x49d   : > { %v877_v33 = vpop.f32.mrf.mxu0 }
 0x49e   : > { %v1037_v34 = vsel %vm1033_vm4, %v877_v33, -1e+30  ;;  %v1609_v33 = vld [vmem:[%s2315_s7] ss:$0 sm:$0xff] }
 0x49f   : > { %v1730_v35 = vpop.f32.mrf.mxu0  ;;  %v1043_v36 = vsel %vm732_vm3, %v1037_v34, -inf }
 0x4a0   : > { %1044 = vmax.xlane.f32.xlu0 %v1043_v36 }
 0x4a1   : > { %v951_v37 = vpop.f32.mrf.mxu0 }
 0x4a2   : > { %v1038_v38 = vsel %vm1033_vm4, %v951_v37, -1e+30 }
 0x4a3   : > { %v1735_v39 = vpop.f32.mrf.mxu0  ;;  %v1046_v40 = vsel %vm732_vm3, %v1038_v38, -inf }
 0x4a4   : > { %1047 = vmax.xlane.f32.xlu1 %v1046_v40 }
 0x4a6   : > { %v1025_v41 = vpop.f32.mrf.mxu1 }
 0x4a7   : > { %v1039_v43 = vsel %vm1033_vm4, %v1025_v41, -1e+30 }
 0x4a8   : > { %v1740_v44 = vpop.f32.mrf.mxu1  ;;  %v1049_v45 = vsel %vm732_vm3, %v1039_v43, -inf }
 0x4a9   : > { %1050 = vmax.xlane.f32.xlu0 %v1049_v45 }
 0x4b5   : > { %723 = vrot.lane.b32.xlu1 %v2204_v25, %s1916_s18  ;;  %s1501_s18 = scalar_lea.hbm %s2316_s8, %s1613_s26 }
 0x4b6   : > { %v1042_v46 = vpop.xlane.xlu1 %1041 }
 0x4b7   : > { %v1052_v47 = vsub.f32 %v1036_v30, %v1042_v46 }
 0x4b9   : > { %v1056_v48 = vmul.f32 1.442695, %v1052_v47 }
 0x4bb   : > { %1830 = vpow2.f32 %v1056_v48 }
 0x4c8   : > { %v1831_v49 = vpop.eup %1830 }
 0x4c9   : > { %v1064_v50 = vsel %vm732_vm3, %v1831_v49, 0.0 }
 0x4d9   : > { %1065 = vadd.xlane.f32.xlu1 %v1064_v50 }
 0x529   : > { %v1045_v51 = vpop.xlane.xlu0 %1044 }
 0x52a   : > { %v1053_v52 = vsub.f32 %v1037_v34, %v1045_v51 }
 0x52c   : > { %v1058_v53 = vmul.f32 1.442695, %v1053_v52 }
 0x52d   : > { %v1048_v42 = vpop.xlane.xlu1 %1047 }
 0x52e   : > { %1832 = vpow2.f32 %v1058_v53  ;;  %v1054_v54 = vsub.f32 %v1038_v38, %v1048_v42 }
 0x530   : > { %v1060_v55 = vmul.f32 1.442695, %v1054_v54 }
 0x531   : > { %v724_v56 = vpop.permute.xlu1 %723 }
 0x532   : > { %1834 = vpow2.f32 %v1060_v55  ;;  %1747 = vmatpush3.msra.mxu1 %v724_v56  ;;  %v1051_v57 = vpop.xlane.xlu0 %1050 }
 0x533   : > { %v1055_v58 = vsub.f32 %v1039_v43, %v1051_v57  ;;  %1756 = vmatprep.subr.mxu1 %v1912_v11 }
 0x535   : > { %v1062_v59 = vmul.f32 1.442695, %v1055_v58 }
 0x537   : > { %1836 = vpow2.f32 %v1062_v59 }
 0x53b   : > { %v1833_v60 = vpop.eup %1832 }
 0x53c   : > { %v1067_v61 = vsel %vm732_vm3, %v1833_v60, 0.0 }
 0x53d   : > { %1068 = vadd.xlane.f32.xlu0 %v1067_v61 }
 0x53f   : > { %v1835_v62 = vpop.eup %1834 }
 0x540   : > { %v1070_v63 = vsel %vm732_vm3, %v1835_v62, 0.0 }
 0x541   : > { %1071 = vadd.xlane.f32.xlu1 %v1070_v63 }
 0x544   : > { %v1837_v1 = vpop.eup %1836 }
 0x545   : > { %v1073_v2 = vsel %vm732_vm3, %v1837_v1, 0.0 }
 0x546   : > { %1074 = vadd.xlane.f32.xlu0 %v1073_v2 }
 0x552   : > { %729 = vrot.lane.b32.xlu1 %v2204_v25, %s1917_s21  ;;  %s1920_s21 = smov 24  }
 0x55c   : > { %726 = vrot.lane.b32.xlu0 %v2204_v25, %s1915_s17  ;;  %s1918_s17 = smov 8  }
 0x562   : > { %v1066_v3 = vpop.xlane.xlu1 %1065 }
 0x563   : > { %1838 = vrcp.f32 %v1066_v3 }
 0x570   : > { %v1839_v4 = vpop.eup %1838 }
 0x571   : > { %v1077_v5 = vmul.f32 %v1839_v4, %v1831_v49 }
 0x573   : > { %1744 = vmatmul.mubr.msk.f32.vlgmr.msra.gmra.mxu0 %vm732_vm3, %v1077_v5 }
 0x574   : > { %1753 = vmatprep.mubr.msk.f32.mxu0 %vm1913_vm1, %v1912_v11 }
 0x5c6   : > { %v1069_v6 = vpop.xlane.xlu0 %1068 }
 0x5c7   : > { %1840 = vrcp.f32 %v1069_v6 }
 0x5ca   : > { %v1072_v7 = vpop.xlane.xlu1 %1071 }
 0x5cb   : > { %1842 = vrcp.f32 %v1072_v7 }
 0x5ce   : > { %v730_v13 = vpop.permute.xlu1 %729 }
 0x5cf   : > { %v1075_v8 = vpop.xlane.xlu0 %1074 }
 0x5d0   : > { %1844 = vrcp.f32 %v1075_v8 }
 0x5d3   : > { %v727_v9 = vpop.permute.xlu0 %726 }
 0x5d4   : > { %v1841_v10 = vpop.eup %1840  ;;  %1752 = vmatpush3.msra.mxu0 %v727_v9 }
 0x5d5   : > { %v1079_v12 = vmul.f32 %v1841_v10, %v1833_v60  ;;  %1761 = vmatprep.subr.mxu0 %v1912_v11 }
 0x5d7   : > { %1749 = vmatmul.mubr.msk.f32.vlgmr.msra.gmra.mxu1 %vm732_vm3, %v1079_v12 }
 0x5d8   : > { %v1843_v14 = vpop.eup %1842  ;;  %1757 = vmatpush3.msra.mxu1 %v730_v13  ;;  %1758 = vmatprep.mubr.msk.f32.mxu1 %vm1913_vm1, %v1912_v11 }
 0x5d9   : > { %v1081_v15 = vmul.f32 %v1843_v14, %v1835_v62 }
 0x5db   : > { %1754 = vmatmul.mubr.msk.f32.vlgmr.msra.gmra.mxu0 %vm732_vm3, %v1081_v15 }
 0x5dc   : > { %1769 = vmatprep.mubr.msk.f32.mxu0 %vm1913_vm1, %v1912_v11  ;;  %1762 = vmatpush3.msra.mxu0 %v1399_v20 }
 0x5dd   : > { %v1845_v16 = vpop.eup %1844  ;;  %1763 = vmatprep.subr.mxu0 %v1912_v11 }
 0x5de   : > { %v1083_v17 = vmul.f32 %v1845_v16, %v1837_v1  ;;  %1764 = vmatpush3.msra.mxu0 %v1398_v21 }
 0x5df   : > { %1765 = vmatprep.subr.mxu0 %v1912_v11 }
 0x5e0   : > { %1759 = vmatmul.mubr.msk.f32.vlgmr.msra.gmra.mxu1 %vm732_vm3, %v1083_v17  ;;  %1766 = vmatpush3.msra.mxu0 %v1397_v22 }
 0x5e1   : > { %1767 = vmatprep.subr.mxu0 %v1912_v11 }
 0x5e2   : > { %1768 = vmatpush3.msra.mxu0 %v1396_v24 }
 0x633   : > { %v1153_v18 = vpop.f32.mrf.mxu0 }
 0x634   : > { %1376 = vst.msk [vmem:[#allocation2] sm:$0xff] %vm732_vm3, %v1153_v18 }
 0x635   : > { %v1745_v19 = vpop.f32.mrf.mxu0 }
 0x697   : > { %v1226_v23 = vpop.f32.mrf.mxu1 }
 0x698   : > { %1378 = vrot.lane.b32.xlu1 %v1226_v23, %s1918_s17 }
 0x699   : > { %v1750_v25 = vpop.f32.mrf.mxu1 }
 0x69b   : > { %v1299_v26 = vpop.f32.mrf.mxu0 }
 0x69c   : > { %1384 = vrot.lane.b32.xlu0 %v1299_v26, %s1919_s20  ;;  %s1850_s20 = scalar_lea.vmem %s1504_s12, 128 }
 0x69d   : > { %v1755_v27 = vpop.f32.mrf.mxu0  ;;  %p1851_p11 = scmp.ne.s32.totalorder %s1504_s12, %s1850_s20 }
 0x69f   : > { %p1852_p12 = pnand %p1851_p11, %p2005_p5 }
 0x6a0   : > { %v1372_v28 = vpop.f32.mrf.mxu1 }
 0x6a1   : > { %1390 = vrot.lane.b32.xlu1 %v1372_v28, %s1920_s21  ;;  %p1853_p13 = pneg %p1852_p12  ;;  %s1921_s21 = smov [#allocation3]  }
 0x6a2   : > { %v1760_v29 = vpop.f32.mrf.mxu1  ;;  %s1854_s22 = sshll.u32 %s1921_s21, 4  ;;  %s1855_s22 = int_to_ptr.vmem [resolvable:$false] %s1854_s22 }
 0x6a3   : > { %s1856_s9 = scalar_lea.vmem %s1855_s22, 256  ;;  %p1857_p0 = scmp.lt.s32.totalorder %s1504_s12, %s1855_s22 }
 0x6a4   : > { %p1858_p1 = scmp.lt.s32.totalorder %s1856_s9, %s1850_s20 }
 0x6a6   : > { %p1859_p2 = por %p1858_p1, %p1857_p0 }
 0x6a8   : > { %p1860_p3 = pnand %p1859_p2, %p1853_p13 }
 0x70a   : > { %v1379_v30 = vpop.permute.xlu1 %1378 }
 0x70b   : > { %1382 = vst.msk [vmem:[#allocation2] sm:$0xff] %vm1381_vm5, %v1379_v30 }
 0x70e   : > { %v1385_v31 = vpop.permute.xlu0 %1384 }
 0x70f   : > { %1388 = vst.msk [vmem:[#allocation2] sm:$0xff] %vm1387_vm6, %v1385_v31 }
 0x713   : > { %v1391_v32 = vpop.permute.xlu1 %1390 }
 0x714   : > { %1394 = vst.msk [vmem:[#allocation2] sm:$0xff] %vm1393_vm7, %v1391_v32 }
 0x71b   : > { %v1395_v11 = vld [vmem:[#allocation2] sm:$0xff] }
 0x71c   : > { %1770 = vmatmul.mubr.msk.f32.vlgmr.msra.gmra.mxu0 %vm304_vm0, %v1395_v11 }
 0x7dc   : > { %v1476_v34 = vpop.f32.mrf.mxu0 }
 0x7dd   : > { %v1477_v35 = vadd.f32 %v1609_v33, %v1476_v34 }
 0x7de   : > { %v1771_v36 = vpop.f32.mrf.mxu0 }
 0x7df   : > { %v1480_v37 = vadd.f32 %v1477_v35, %v2020_v0 }
 0x7e1   : > { %v1611_v38 = vmul.f32 -1.442695, %v1480_v37 }
 0x7e3   : > { %1846 = vpow2.f32 %v1611_v38 }
 0x7f0   : > { %v1847_v39 = vpop.eup %1846 }
 0x7f1   : > { %v1484_v40 = vadd.f32 1.0, %v1847_v39 }
 0x7f3   : > { %1848 = vrcp.f32 %v1484_v40 }
 0x800   : > { %v1849_v41 = vpop.eup %1848 }
 0x801   : > { %v1487_v43 = vmul.f32 %v1849_v41, %v1480_v37 }
 0x803   : > { %1488 = vst.msk [vmem:[%s296_s10] sm:$0xff] %vm304_vm0, %v1487_v43 }
 0x804   : > { %1863 = shalt.err (!%p1860_p3)
}
 0x805   : > { %s1864_s23 = scalar_lea.hbm %s1501_s18, 128  ;;  %s1868_s26 = scalar_lea.hbm %s2316_s8, 256 }
 0x806   : > { %p1865_p4 = scmp.ne.s32.totalorder %s1501_s18, %s1864_s23  ;;  %p1869_p9 = scmp.lt.s32.totalorder %s1501_s18, %s2316_s8 }
 0x807   : > { %p1870_p10 = scmp.lt.s32.totalorder %s1868_s26, %s1864_s23 }
 0x808   : > { %p1866_p7 = pnand %p1865_p4, %p2005_p5 }
 0x809   : > { %p1871_p11 = por %p1870_p10, %p1869_p9 }
 0x80a   : > { %p1867_p8 = pneg %p1866_p7 }
 0x80c   : > { %p1872_p12 = pnand %p1871_p11, %p1867_p8 }
 0x80e   : > { %1875 = shalt.err (!%p1872_p12)
}
 0x80f   : > { %1772 = dma.vmem_to_hbm [thread:$0]  (%p2005_p5), %s1504_s12, 128, %s1501_s18, %s1490_s19  }
 0x810 PF: > { %p1778_p13 = scmp.ge.s32.totalorder %s1910_s30, 2  ;;  %s1515_s17 = sand.u32 1, %s1898_s27  }
 0x811   : > { %s1516_s20 = scalar_lea.sflag [#allocation4], %s1515_s17 }
 0x812   : > { %p1775_p0 = pnand %p1778_p13, %p2009_p6 }
 0x814   : > { %p1776_p1 = pneg %p1775_p0 }
 0x816   : > { %1893 = dma.done.wait (%p1776_p1), %s1516_s20, 128  }
 0x817   : > { %1895 = vsyncadd (%p1776_p1), %s1516_s20, 4294967168  ;;  %p18_p2 = scmp.ge.s32.totalorder %s1992_s11, 4   ;;  %s2319_s27 = smov %s1902_s28 }
 0x818   : > { %s2320_s28 = smov %s1906_s29  ;;  %s2321_s29 = smov %s2003_s14 }
 0x819   : > { %s2322_s30 = smov %s1992_s11  ;;  %20 = sbr.rel (!%p18_p2) target bundleno = 3 (0x3), region = 91 }
 0x81e   :  { %1521 = vsyncpa [#allocation4], 1 }
 0x81f   :  { %1523 = vsyncpa [#allocation4 + $0x1], 1 }

</bundles_post_ra>
